<compile_context>
chip_gen: v7x
topology: tpu7x:2x2x1
jax: 0.10.0
libtpu: 0.0.40
codegen_flags: <defaults>
</compile_context>

<pallas_src>
import functools

import jax
import jax.numpy as jnp
from jax.experimental import pallas as pl
from jax.experimental.pallas import tpu as pltpu


def _round_up(x, m):
    return -(-x // m) * m


def _cdiv(a, b):
    return -(-a // b)


def _usable_vmem_bytes():
    """Physical VMEM minus headroom for Mosaic internals, per generation."""
    phys = 64 << 20                       # conservative default (v7x per-TC VMEM)
    try:
        info = pltpu.get_tpu_info()
        phys = int(getattr(info, "vmem_capacity_bytes", phys)) or phys
    except Exception:
        pass
    # Leave >=16 MiB headroom; never ask for more than ~100 MiB even on
    # 128 MiB parts (v5e/v6e), never less than 32 MiB.
    return max(min(phys - (16 << 20), 100 << 20), 32 << 20)


# ----------------------------------------------------------------------------
# Fused path: one row tile holds the full H*W extent (block last dim == hw,
# so no lane masking is needed).  Single-pass statistics, no f32 "centered"
# temporary.
# ----------------------------------------------------------------------------
def _adain_fused_kernel(x_ref, w_ref, b_ref, o_ref, *, eps, hw):
    x = x_ref[...].astype(jnp.float32)                        # (tr, hw)
    inv_n = 1.0 / hw
    mean = jnp.sum(x, axis=-1, keepdims=True) * inv_n
    ex2 = jnp.sum(x * x, axis=-1, keepdims=True) * inv_n
    var = jnp.maximum(ex2 - mean * mean, 0.0)
    scale = jax.lax.rsqrt(var + eps) * w_ref[...].astype(jnp.float32)
    shift = b_ref[...].astype(jnp.float32) - mean * scale
    o_ref[...] = (x * scale + shift).astype(o_ref.dtype)


# ----------------------------------------------------------------------------
# Split path (very large H*W): pass 1 accumulates sum / sum-of-squares across
# column tiles and emits per-row scale/shift; pass 2 applies them.
# ----------------------------------------------------------------------------
def _adain_stats_kernel(x_ref, w_ref, b_ref, scale_ref, shift_ref, sum_ref, sq_ref,
                        *, eps, hw, hw_tile, mask_lanes):
    j = pl.program_id(1)

    @pl.when(j == 0)
    def _():
        sum_ref[...] = jnp.zeros_like(sum_ref)
        sq_ref[...] = jnp.zeros_like(sq_ref)

    x = x_ref[...].astype(jnp.float32)                        # (tr, hw_tile)
    if mask_lanes:
        col = j * hw_tile + jax.lax.broadcasted_iota(jnp.int32, x.shape, 1)
        x = jnp.where(col < hw, x, 0.0)

    sum_ref[...] = sum_ref[...] + jnp.sum(x, axis=-1, keepdims=True)
    sq_ref[...] = sq_ref[...] + jnp.sum(x * x, axis=-1, keepdims=True)

    @pl.when(j == pl.num_programs(1) - 1)
    def _():
        inv_n = 1.0 / hw
        mean = sum_ref[...] * inv_n
        var = jnp.maximum(sq_ref[...] * inv_n - mean * mean, 0.0)
        scale = jax.lax.rsqrt(var + eps) * w_ref[...].astype(jnp.float32)
        scale_ref[...] = scale
        shift_ref[...] = b_ref[...].astype(jnp.float32) - mean * scale


def _adain_norm_kernel(x_ref, scale_ref, shift_ref, o_ref):
    x = x_ref[...].astype(jnp.float32)
    o_ref[...] = (x * scale_ref[...] + shift_ref[...]).astype(o_ref.dtype)


# ----------------------------------------------------------------------------
# Wrapper
# ----------------------------------------------------------------------------
def adaptive_instance_norm_2d(x, weight, bias, eps=1e-5, *, vmem_budget_bytes=None):
    """x: (B, C, H, W); weight, bias: (B*C,).  Returns (B, C, H, W)."""
    b, c, h, w = x.shape
    bc = b * c
    hw = h * w
    assert weight.shape == (bc,) and bias.shape == (bc,)

    x_bytes = jnp.dtype(x.dtype).itemsize
    sub = max(8, 32 // max(x_bytes, 1))          # sublane packing multiple
    hw128 = _round_up(hw, 128)                   # lane-padded VMEM width
    bc_al = _round_up(bc, sub)

    usable = _usable_vmem_bytes()
    budget = usable if vmem_budget_bytes is None else min(int(vmem_budget_bytes), usable)

    # Per-element VMEM cost of an x tile: in + out (double-buffered, at x.dtype)
    # plus in-kernel f32 temporaries.
    per_elem = 2 * 2 * x_bytes + 2 * 4
    slack = 4 << 20
    tile_budget = budget - slack

    x2 = x.reshape(bc, hw)                       # metadata reshape only
    w2 = weight.reshape(bc, 1)
    b2 = bias.reshape(bc, 1)

    fused_ok = tile_budget >= per_elem * sub * hw128

    if fused_ok:
        # Largest sublane-aligned row tile whose double-buffered footprint fits.
        tr_cap = max(sub, (tile_budget // (per_elem * hw128)) // sub * sub)
        max_blocks = bc_al // sub
        nblk = _cdiv(bc_al, tr_cap)              # fewest row blocks that fit
        if nblk < 2 and max_blocks >= 2:
            nblk = 2                             # give both v7x TCs work
        if nblk % 2 == 1 and nblk < max_blocks:
            nblk += 1                            # even block count for 2-TC balance
        tr = _round_up(_cdiv(bc_al, nblk), sub)
        grid_rows = _cdiv(bc, tr)

        needed = (2 * 2 * tr * hw128 * x_bytes   # x in + out tiles, double-buffered
                  + 2 * tr * hw128 * 4           # in-kernel f32 temporaries
                  + 2 * 2 * 2 * tr * 128 * 4     # (tr,1) w/b tiles (lane-padded)
                  + slack)
        vmem_limit = int(min(max(needed, 32 << 20), usable))

        out = pl.pallas_call(
            functools.partial(_adain_fused_kernel, eps=eps, hw=hw),
            out_shape=jax.ShapeDtypeStruct((bc, hw), x.dtype),
            grid_spec=pltpu.PrefetchScalarGridSpec(
                num_scalar_prefetch=0,
                grid=(grid_rows,),
                in_specs=[
                    pl.BlockSpec((tr, hw), lambda i: (i, 0)),
                    pl.BlockSpec((tr, 1), lambda i: (i, 0)),
                    pl.BlockSpec((tr, 1), lambda i: (i, 0)),
                ],
                out_specs=pl.BlockSpec((tr, hw), lambda i: (i, 0)),
            ),
            compiler_params=pltpu.CompilerParams(
                dimension_semantics=("parallel",),
                vmem_limit_bytes=vmem_limit,
            ),
        )(x2, w2, b2)

    else:
        # HW-split path.  Row tile: prefer 64-128 rows, keep >= 2 row blocks.
        tr = min(_round_up(min(128, bc_al), sub), bc_al)
        if tr >= bc_al and bc_al >= 2 * sub:
            tr = _round_up(_cdiv(bc_al, 2), sub)
        while tr > sub and per_elem * tr * 128 > max(tile_budget, 0):
            tr -= sub
        tr = max(tr, sub)

        # Column tile: largest 128-multiple under budget, then re-balanced so
        # the tiles divide the 128-aligned spatial extent evenly.
        hw_tile_cap = max(128, (max(tile_budget, 0) // (per_elem * tr)) // 128 * 128)
        hw_tile_cap = min(hw_tile_cap, hw128)
        ncols = _cdiv(hw128, hw_tile_cap)
        hw_tile = _round_up(_cdiv(hw128, ncols), 128)

        grid_rows = _cdiv(bc, tr)
        grid_cols = _cdiv(hw, hw_tile)
        mask_lanes = (hw % hw_tile) != 0

        needed = (2 * 2 * tr * hw_tile * x_bytes
                  + 2 * tr * hw_tile * 4
                  + 8 * 2 * tr * 128 * 4
                  + slack)
        vmem_limit = int(min(max(needed, 32 << 20), usable))

        scale_arr, shift_arr = pl.pallas_call(
            functools.partial(_adain_stats_kernel, eps=eps, hw=hw,
                              hw_tile=hw_tile, mask_lanes=mask_lanes),
            out_shape=(jax.ShapeDtypeStruct((bc, 1), jnp.float32),
                       jax.ShapeDtypeStruct((bc, 1), jnp.float32)),
            grid_spec=pltpu.PrefetchScalarGridSpec(
                num_scalar_prefetch=0,
                grid=(grid_rows, grid_cols),
                in_specs=[
                    pl.BlockSpec((tr, hw_tile), lambda i, j: (i, j)),
                    pl.BlockSpec((tr, 1), lambda i, j: (i, 0)),
                    pl.BlockSpec((tr, 1), lambda i, j: (i, 0)),
                ],
                out_specs=[pl.BlockSpec((tr, 1), lambda i, j: (i, 0)),
                           pl.BlockSpec((tr, 1), lambda i, j: (i, 0))],
                scratch_shapes=[pltpu.VMEM((tr, 1), jnp.float32),
                                pltpu.VMEM((tr, 1), jnp.float32)],
            ),
            compiler_params=pltpu.CompilerParams(
                dimension_semantics=("parallel", "arbitrary"),
                vmem_limit_bytes=vmem_limit,
            ),
        )(x2, w2, b2)

        out = pl.pallas_call(
            _adain_norm_kernel,
            out_shape=jax.ShapeDtypeStruct((bc, hw), x.dtype),
            grid_spec=pltpu.PrefetchScalarGridSpec(
                num_scalar_prefetch=0,
                grid=(grid_rows, grid_cols),
                in_specs=[
                    pl.BlockSpec((tr, hw_tile), lambda i, j: (i, j)),
                    pl.BlockSpec((tr, 1), lambda i, j: (i, 0)),
                    pl.BlockSpec((tr, 1), lambda i, j: (i, 0)),
                ],
                out_specs=pl.BlockSpec((tr, hw_tile), lambda i, j: (i, j)),
            ),
            compiler_params=pltpu.CompilerParams(
                dimension_semantics=("parallel", "parallel"),
                vmem_limit_bytes=vmem_limit,
            ),
        )(x2, scale_arr, shift_arr)

    # TODO(synk): running_mean/running_var momentum update is a training-time
    # buffer side effect in PyTorch and does not influence the forward output;
    # not materialized here.
    return out.reshape(b, c, h, w)


def _reference(x, weight, bias, eps=1e-5):
    b, c, h, w = x.shape
    x2 = x.reshape(b * c, h * w).astype(jnp.float32)
    mean = jnp.mean(x2, axis=-1, keepdims=True)
    var = jnp.mean((x2 - mean) ** 2, axis=-1, keepdims=True)
    y = (x2 - mean) / jnp.sqrt(var + eps)
    y = y * weight[:, None].astype(jnp.float32) + bias[:, None].astype(jnp.float32)
    return y.reshape(b, c, h, w).astype(x.dtype)


if __name__ == "__main__":
    key = jax.random.PRNGKey(0)
    k_x, k_w, k_b, k_x2, k_w2, k_b2 = jax.random.split(key, 6)

    # --- Main test: B=2, C=4, 16x16 spatial (lane-aligned HW) ---------------
    B, C, H, W = 2, 4, 16, 16
    x = jax.random.normal(k_x, (B, C, H, W), dtype=jnp.float32)
    weight = jax.random.normal(k_w, (B * C,), dtype=jnp.float32) * 0.5 + 1.0
    bias = jax.random.normal(k_b, (B * C,), dtype=jnp.float32) * 0.1

    out = jax.block_until_ready(adaptive_instance_norm_2d(x, weight, bias, eps=1e-5))
    ref = _reference(x, weight, bias, eps=1e-5)
    assert out.shape == (B, C, H, W)
    assert jnp.allclose(out, ref, atol=1e-4, rtol=1e-4)

    # --- Odd shapes: B*C not a multiple of 8, H*W not a multiple of 128 -----
    B2, C2, H2, W2 = 3, 5, 10, 10
    x_b = jax.random.normal(k_x2, (B2, C2, H2, W2), dtype=jnp.float32)
    w_b = jax.random.normal(k_w2, (B2 * C2,), dtype=jnp.float32) * 0.5 + 1.0
    b_b = jax.random.normal(k_b2, (B2 * C2,), dtype=jnp.float32) * 0.1
    out_b = jax.block_until_ready(adaptive_instance_norm_2d(x_b, w_b, b_b))
    ref_b = _reference(x_b, w_b, b_b)
    assert jnp.allclose(out_b, ref_b, atol=1e-4, rtol=1e-4)

    # --- bf16 input stays on the fused path (dtype-aware sizing) ------------
    x_h = x.astype(jnp.bfloat16)
    out_h = jax.block_until_ready(adaptive_instance_norm_2d(x_h, weight, bias))
    ref_h = _reference(x_h, weight, bias)
    assert out_h.dtype == jnp.bfloat16
    assert jnp.allclose(out_h.astype(jnp.float32), ref_h.astype(jnp.float32),
                        atol=3e-2, rtol=3e-2)

    # --- Force the HW-split (large-spatial) path with a tiny VMEM budget ----
    out_c = jax.block_until_ready(
        adaptive_instance_norm_2d(x, weight, bias, vmem_budget_bytes=16 * 1024))
    assert jnp.allclose(out_c, ref, atol=1e-4, rtol=1e-4)

    print("KERNEL_OK")
</pallas_src>

<mosaic_0001>
module attributes {stable_mosaic.version = 11 : i64} {
  func.func @_adain_fused_kernel(%arg0: i32, %arg1: memref<8x256xf32, #tpu.memory_space<vmem>>, %arg2: memref<8x1xf32, #tpu.memory_space<vmem>>, %arg3: memref<8x1xf32, #tpu.memory_space<vmem>>, %arg4: memref<8x256xf32, #tpu.memory_space<vmem>>) attributes {dimension_semantics = [#tpu.dimension_semantics<parallel>], iteration_bounds = array<i64: 1>, scalar_prefetch = 0 : i64, scratch_operands = 0 : i64, tpu.core_type = #tpu.core_type<tc>, window_params = [{transform_indices = @transform_0, window_bounds = array<i64: 8, 256>}, {transform_indices = @transform_1, window_bounds = array<i64: 8, 1>}, {transform_indices = @transform_2, window_bounds = array<i64: 8, 1>}, {transform_indices = @transform_3, window_bounds = array<i64: 8, 256>}]} {
    %c0 = arith.constant 0 : index
    %c0_0 = arith.constant 0 : index
    %0 = vector.load %arg1[%c0, %c0_0] : memref<8x256xf32, #tpu.memory_space<vmem>>, vector<8x256xf32>
    %cst = arith.constant dense<0.000000e+00> : vector<8xf32>
    %1 = vector.multi_reduction <add>, %0, %cst [1] : vector<8x256xf32> to vector<8xf32>
    %2 = vector.shape_cast %1 : vector<8xf32> to vector<8x1xf32>
    %cst_1 = arith.constant 3.906250e-03 : f32
    %3 = vector.broadcast %cst_1 : f32 to vector<8x1xf32>
    %4 = arith.mulf %2, %3 : vector<8x1xf32>
    %5 = arith.mulf %0, %0 : vector<8x256xf32>
    %cst_2 = arith.constant dense<0.000000e+00> : vector<8xf32>
    %6 = vector.multi_reduction <add>, %5, %cst_2 [1] : vector<8x256xf32> to vector<8xf32>
    %7 = vector.shape_cast %6 : vector<8xf32> to vector<8x1xf32>
    %cst_3 = arith.constant 3.906250e-03 : f32
    %8 = vector.broadcast %cst_3 : f32 to vector<8x1xf32>
    %9 = arith.mulf %7, %8 : vector<8x1xf32>
    %10 = arith.mulf %4, %4 : vector<8x1xf32>
    %11 = arith.subf %9, %10 : vector<8x1xf32>
    %cst_4 = arith.constant 0.000000e+00 : f32
    %12 = vector.broadcast %cst_4 : f32 to vector<8x1xf32>
    %13 = arith.maximumf %11, %12 : vector<8x1xf32>
    %cst_5 = arith.constant 9.99999974E-6 : f32
    %14 = vector.broadcast %cst_5 : f32 to vector<8x1xf32>
    %15 = arith.addf %13, %14 : vector<8x1xf32>
    %16 = math.rsqrt %15 : vector<8x1xf32>
    %c0_6 = arith.constant 0 : index
    %c0_7 = arith.constant 0 : index
    %17 = vector.load %arg2[%c0_6, %c0_7] : memref<8x1xf32, #tpu.memory_space<vmem>>, vector<8x1xf32>
    %18 = arith.mulf %16, %17 : vector<8x1xf32>
    %c0_8 = arith.constant 0 : index
    %c0_9 = arith.constant 0 : index
    %19 = vector.load %arg3[%c0_8, %c0_9] : memref<8x1xf32, #tpu.memory_space<vmem>>, vector<8x1xf32>
    %20 = arith.mulf %4, %18 : vector<8x1xf32>
    %21 = arith.subf %19, %20 : vector<8x1xf32>
    %22 = vector.broadcast %18 : vector<8x1xf32> to vector<8x256xf32>
    %23 = arith.mulf %0, %22 : vector<8x256xf32>
    %24 = vector.broadcast %21 : vector<8x1xf32> to vector<8x256xf32>
    %25 = arith.addf %23, %24 : vector<8x256xf32>
    %c0_10 = arith.constant 0 : index
    %c0_11 = arith.constant 0 : index
    %26 = vector.load %arg4[%c0_10, %c0_11] : memref<8x256xf32, #tpu.memory_space<vmem>>, vector<8x256xf32>
    tpu.vector_store %arg4[%c0_10, %c0_11], %25 {strides = array<i32>} : memref<8x256xf32, #tpu.memory_space<vmem>>, vector<8x256xf32>,
    return
  }
  func.func @transform_0(%arg0: i32) -> (i32, i32) {
    %c0_i32 = arith.constant 0 : i32
    %c0_i32_0 = arith.constant 0 : i32
    return %arg0, %c0_i32 : i32, i32
  }
  func.func @transform_1(%arg0: i32) -> (i32, i32) {
    %c0_i32 = arith.constant 0 : i32
    %c0_i32_0 = arith.constant 0 : i32
    return %arg0, %c0_i32 : i32, i32
  }
  func.func @transform_2(%arg0: i32) -> (i32, i32) {
    %c0_i32 = arith.constant 0 : i32
    %c0_i32_0 = arith.constant 0 : i32
    return %arg0, %c0_i32 : i32, i32
  }
  func.func @transform_3(%arg0: i32) -> (i32, i32) {
    %c0_i32 = arith.constant 0 : i32
    %c0_i32_0 = arith.constant 0 : i32
    return %arg0, %c0_i32 : i32, i32
  }
}

</mosaic_0001>

<bundles_post_ra>
// kernel: tpu_custom_call.1
= control target key start
LH: loop header
LB: loop body
LE: loop exit
PB: predicated region body
PF: predicated region fallthrough
CT: control target
= control target key end

     0   :  { %s143_s0 = inlined_call_operand.vmem [shape: f32[8,256], index: 0, kind: input, shape index: {}]   ;;  %s144_s1 = inlined_call_operand.vmem [shape: f32[8,1], index: 1, kind: input, shape index: {}]   ;;  %s145_s2 = inlined_call_operand.vmem [shape: f32[8,1], index: 2, kind: input, shape index: {}]   ;;  %s146_s3 = inlined_call_operand.hbm [shape: f32[8,256], index: 3, kind: output, shape index: {}]  }
   0x1   :  { %v15_v0 = vld [vmem:[%s143_s0] sm:$0xff]  ;;  %v16_v1 = vld [vmem:[%s143_s0 + $0x8] sm:$0xff] }
   0x2   :  { %8 = vsyncpa [#allocation3], 0  ;;  %v17_v2 = vadd.f32 %v16_v1, %v15_v0  ;;  %v21_v3 = vmul.f32 %v15_v0, %v15_v0  ;;  %v22_v4 = vmul.f32 %v16_v1, %v16_v1  ;;  %v97_v6 = vmov 0   ;;  %v32_v15 = vld [vmem:[%s144_s1] sm:$0xff]  ;;  %s98_s19 = smov [#allocation2]  }
   0x3   :  { %69 = vset.pattern.permute.xlu1 %v97_v6  ;;  %70 = vset.pattern.permute.xlu0 %v97_v6  ;;  %v34_v18 = vld [vmem:[%s145_s2] sm:$0xff]  ;;  %s59_s20 = sshll.u32 %s98_s19, 4  ;;  %s60_s20 = int_to_ptr.vmem [resolvable:$true] %s59_s20 }
   0x4   :  { %18 = vadd.xlane.f32.xlu0 %v17_v2  ;;  %v23_v5 = vadd.f32 %v22_v4, %v21_v3  ;;  %s73_s1 = scalar_lea.vmem %s60_s20, 256  ;;  %p78_p1 = scmp.lt.s32.totalorder %s60_s20, %s60_s20 }
   0x5   :  { %p74_p0 = scmp.ne.s32.totalorder %s60_s20, %s73_s1  ;;  %p79_p2 = scmp.lt.s32.totalorder %s73_s1, %s73_s1 }
   0x7   :  { %p80_p3 = por %p79_p2, %p78_p1 }
   0x8   :  { %24 = vadd.xlane.f32.xlu0 %v23_v5 }
   0x9   :  { %p81_p4 = pnand %p80_p3, %p74_p0 }
  0x91   :  { %v19_v7 = vpop.xlane.xlu0 %18 }
  0x92   :  { %v20_v8 = vmul.f32 0.00390625, %v19_v7 }
  0x94   :  { %v27_v10 = vmul.f32 %v20_v8, %v20_v8 }
  0x95   :  { %v25_v9 = vpop.xlane.xlu0 %24 }
  0x96   :  { %v26_v11 = vmul.f32 0.00390625, %v25_v9 }
  0x98   :  { %v28_v12 = vsub.f32 %v26_v11, %v27_v10 }
  0x9a   :  { %v29_v13 = vmax.f32 %v28_v12, 0.0 }
  0x9c   :  { %v30_v14 = vadd.f32 1e-05, %v29_v13 }
  0x9e   :  { %71 = vrsqrt.f32 %v30_v14 }
  0xa8   :  { %v72_v16 = vpop.eup %71 }
  0xa9   :  { %v33_v17 = vmul.f32 %v72_v16, %v32_v15 }
  0xab   :  { %39 = vperm.xlu1 %69, %v33_v17   ;;  %v35_v19 = vmul.f32 %v33_v17, %v20_v8 }
  0xad   :  { %v36_v20 = vsub.f32 %v34_v18, %v35_v19 }
  0xaf   :  { %46 = vperm.xlu1 %69, %v36_v20  }
 0x12a   :  { %v40_v21 = vpop.permute.xlu1 %39 }
 0x12b   :  { %v42_v22 = vmul.f32 %v40_v21, %v15_v0  ;;  %v43_v23 = vmul.f32 %v40_v21, %v16_v1 }
 0x12e   :  { %v47_v24 = vpop.permute.xlu1 %46 }
 0x12f   :  { %v49_v25 = vadd.f32 %v47_v24, %v42_v22  ;;  %v50_v26 = vadd.f32 %v47_v24, %v43_v23 }
 0x131   :  { %51 = vst [vmem:[#allocation2] sm:$0xff] %v49_v25  ;;  %52 = vst [vmem:[#allocation2 + $0x8] sm:$0xff] %v50_v26 }
 0x132   :  { %84 = shalt.err (!%p81_p4)
}
 0x133   :  { %s85_s22 = scalar_lea.hbm %s146_s3, 256 }
 0x134   :  { %p86_p5 = scmp.ne.s32.totalorder %s146_s3, %s85_s22  ;;  %p89_p6 = scmp.lt.u32.totalorder %s85_s22, %s146_s3 }
 0x136   :  { %p91_p7 = pnand %p89_p6, %p86_p5 }
 0x138   :  { %94 = shalt.err (!%p91_p7)
}
 0x139   :  { %62 = dma.vmem_to_hbm [thread:$0]  %s60_s20, 256, %s146_s3, [#allocation3]  }
 0x13a   :  { %95 = dma.done.wait [#allocation3], 256  }
 0x13b   :  { %96 = vsyncadd [#allocation3], 4294967040 }
 0x13c   :  { %66 = vsyncpa [#allocation3], 1 }

</bundles_post_ra>
